<compile_context>
chip_gen: v5e
topology: v5e:2x2
jax: 0.10.0
libtpu: 0.0.40
codegen_flags: <defaults>
</compile_context>

<pallas_src>
import functools

import jax
import jax.numpy as jnp
from jax import lax
from jax.experimental import pallas as pl
from jax.experimental.pallas import tpu as pltpu


def _mcc_attn_kernel(scalars_ref,                      # SMEM: [N_real, unseen]
                     x_ref, wqkv_ref, wproj_ref, bproj_ref,   # inputs
                     o_ref,                                    # output
                     slab_ref,                                 # VMEM scratch
                     *, num_heads, block_b, scale, compute_dtype, approx_recip):
    cdt = compute_dtype
    rows, C = x_ref.shape                   # rows == block_b * Np
    Np = rows // block_b
    hd = C // num_heads

    n_real = scalars_ref[0]
    unseen = scalars_ref[1]

    # Fused qkv projection: x (rows, C) · Wqkv (3C, C) contracting C of both
    # (i.e. x @ Wqkv^T) — weights consumed un-transposed, cast on the VPU,
    # f32 accumulation on the MXU.
    xc = x_ref[...].astype(cdt)
    wqkv = wqkv_ref[...].astype(cdt)
    qkv = lax.dot_general(xc, wqkv, (((1,), (1,)), ((), ())),
                          preferred_element_type=jnp.float32)   # (rows, 3C) f32

    # Fold the attention scale into Q once (one rows×C pass, not per-head
    # N×N score scaling).
    q = (qkv[:, 0:C] * scale).astype(cdt)
    k = qkv[:, C:2 * C].astype(cdt)
    v = qkv[:, 2 * C:3 * C].astype(cdt)

    # Additive mask built in-kernel from the SMEM scalars.  Last `unseen`
    # real key columns are masked except their diagonal entries; padded key
    # columns (>= n_real) are always masked.  -1e30 instead of -inf keeps
    # fully-masked padded rows finite.
    r_idx = lax.broadcasted_iota(jnp.int32, (Np, Np), 0)
    c_idx = lax.broadcasted_iota(jnp.int32, (Np, Np), 1)
    masked = jnp.logical_or(
        jnp.logical_and(c_idx >= n_real - unseen, r_idx != c_idx),
        c_idx >= n_real)
    mask = jnp.where(masked, jnp.float32(-1e30), jnp.float32(0.0))

    for h in range(num_heads):              # static, short loop over heads
        lo = h * hd
        hi = lo + hd
        qh = q[:, lo:hi].reshape(block_b, Np, hd)
        kh = k[:, lo:hi].reshape(block_b, Np, hd)
        vh = v[:, lo:hi].reshape(block_b, Np, hd)

        # QK^T batched over the block's batches; K consumed in natural layout.
        s = jnp.einsum('bqd,bkd->bqk', qh, kh,
                       preferred_element_type=jnp.float32)      # (bb, Np, Np)
        s = s + mask

        m = jnp.max(s, axis=-1, keepdims=True)
        p = jnp.exp(s - m)
        denom = jnp.sum(p, axis=-1, keepdims=True)
        inv = pl.reciprocal(denom, approx=approx_recip)          # EUP slot

        oh = jnp.einsum('bqk,bkd->bqd', p.astype(cdt), vh,
                        preferred_element_type=jnp.float32)      # (bb, Np, hd)
        oh = oh * inv
        # Write into the f32 slab at this head's lane offset (no concat, no
        # long-lived per-head registers).
        slab_ref[:, lo:hi] = oh.reshape(rows, hd)

    # Single full-K output projection from the slab: slab @ Wproj^T + bias.
    out = slab_ref[...].astype(cdt)
    wproj = wproj_ref[...].astype(cdt)
    proj = lax.dot_general(out, wproj, (((1,), (1,)), ((), ())),
                           preferred_element_type=jnp.float32)
    proj = proj + bproj_ref[...].astype(jnp.float32)
    o_ref[...] = proj.astype(o_ref.dtype)


def _has_multiple_tensorcores():
    """Best-effort check for parts exposing >1 TensorCore to one program."""
    try:
        kind = (jax.devices()[0].device_kind or "").lower()
    except Exception:
        return False
    return any(tag in kind for tag in ("v4", "v5p", "v7", "7x"))


def mcc_decoder_attention(x, w_qkv, w_proj, b_proj, unseen_size, num_heads,
                          *, block_b=None, compute_dtype=jnp.bfloat16,
                          approx_reciprocal=True):
    """x: (B, N, C); w_qkv: (3C, C); w_proj: (C, C); b_proj: (C,)."""
    B, N, C = x.shape
    assert C % num_heads == 0
    hd = C // num_heads
    scale = float(hd) ** -0.5
    out_dtype = x.dtype

    # Pad the token dim to a sublane multiple so the in-kernel
    # (rows, hd) -> (block_b, Np, hd) reshapes stay relayout-free; padded keys
    # are masked in-kernel, padded query rows are sliced off below.
    Np = ((N + 7) // 8) * 8
    if Np != N:
        x = jnp.pad(x, ((0, 0), (0, Np - N), (0, 0)))

    # Generation-aware VMEM budget (v5e/v6e ~128 MiB, v7x 64 MiB per TC).
    try:
        vmem_cap = int(getattr(pltpu.get_tpu_info(), "vmem_capacity_bytes",
                               64 * 1024 * 1024))
    except Exception:
        vmem_cap = 64 * 1024 * 1024

    x_isz = x.dtype.itemsize
    o_isz = jnp.dtype(out_dtype).itemsize
    w_isz = w_qkv.dtype.itemsize

    def _vmem_estimate(bb):
        rows = bb * Np
        b_io = 2 * rows * C * (x_isz + o_isz)            # double-buffered x / out
        b_w = (3 * C * C + C * C + C) * w_isz            # single-buffered weights
        b_slab = rows * C * 4                            # f32 head-output slab
        b_tmp = rows * 4 * C * 4 + 2 * bb * Np * Np * 4  # qkv/q f32 + scores
        return b_io + b_w + b_slab + b_tmp

    if block_b is None:
        budget = int(0.6 * vmem_cap)
        block_b = 1
        for bb in range(1, B + 1):
            if _vmem_estimate(bb) <= budget and bb * Np <= 8192:
                block_b = bb
            else:
                break
        # Only split for multi-TensorCore parts, and only when each block
        # keeps an MXU-dense fused-M dimension.
        if (_has_multiple_tensorcores() and block_b == B and B >= 2
                and (B // 2) * Np >= 256):
            block_b = max(1, B // 2)

    num_blocks = pl.cdiv(B, block_b)
    Bp = num_blocks * block_b
    if Bp != B:
        x = jnp.pad(x, ((0, Bp - B), (0, 0), (0, 0)))

    rows_blk = block_b * Np
    # Flatten batch*tokens so the qkv / proj matmuls see an MXU-dense M dim.
    # No wrapper-side casts or weight transposes (kernel handles both).
    x2 = x.reshape(Bp * Np, C)
    bproj2 = b_proj.reshape(1, C)
    scalars = jnp.array([N, unseen_size], dtype=jnp.int32)

    kernel = functools.partial(
        _mcc_attn_kernel, num_heads=num_heads, block_b=block_b, scale=scale,
        compute_dtype=compute_dtype, approx_recip=approx_reciprocal)

    const = lambda i, s: (0, 0)
    out2 = pl.pallas_call(
        kernel,
        out_shape=jax.ShapeDtypeStruct((Bp * Np, C), out_dtype),
        grid_spec=pltpu.PrefetchScalarGridSpec(
            num_scalar_prefetch=1,
            grid=(num_blocks,),
            in_specs=[
                pl.BlockSpec((rows_blk, C), lambda i, s: (i, 0)),        # x rows
                pl.BlockSpec((3 * C, C), const,
                             pipeline_mode=pl.Buffered(1)),              # Wqkv
                pl.BlockSpec((C, C), const,
                             pipeline_mode=pl.Buffered(1)),              # Wproj
                pl.BlockSpec((1, C), const,
                             pipeline_mode=pl.Buffered(1)),              # bias
            ],
            out_specs=pl.BlockSpec((rows_blk, C), lambda i, s: (i, 0)),
            scratch_shapes=[pltpu.VMEM((rows_blk, C), jnp.float32)],
        ),
        compiler_params=pltpu.CompilerParams(
            dimension_semantics=("parallel",),
            vmem_limit_bytes=max(32 * 1024 * 1024, int(0.85 * vmem_cap))),
    )(scalars, x2, w_qkv, w_proj, bproj2)

    out = out2.reshape(Bp, Np, C)
    return out[:B, :N]


def _reference(x, w_qkv, w_proj, b_proj, unseen_size, num_heads):
    """Pure-JAX replica of the PyTorch forward, for verification."""
    B, N, C = x.shape
    hd = C // num_heads
    scale = hd ** (-0.5)
    qkv = x @ w_qkv.T                                         # (B, N, 3C)
    qkv = qkv.reshape(B, N, 3, num_heads, hd).transpose(2, 0, 3, 1, 4)
    q, k, v = qkv[0], qkv[1], qkv[2]                          # (B, H, N, hd)
    attn = jnp.einsum('bhnd,bhmd->bhnm', q, k) * scale
    mask = jnp.zeros((N, N), jnp.float32)
    mask = mask.at[:, N - unseen_size:].set(-jnp.inf)
    idx = jnp.arange(N - unseen_size, N)
    mask = mask.at[idx, idx].set(0.0)
    attn = attn + mask[None, None]
    attn = jax.nn.softmax(attn, axis=-1)
    out = jnp.einsum('bhnm,bhmd->bhnd', attn, v)
    out = out.transpose(0, 2, 1, 3).reshape(B, N, C)
    return out @ w_proj.T + b_proj[None, None, :]


if __name__ == "__main__":
    # Small shapes consistent with the module: dim=32, num_heads=4 (head_dim=8),
    # B=2 batch, N=8 tokens, unseen_size=3.
    B, N, C = 2, 8, 32
    num_heads = 4
    unseen_size = 3

    key = jax.random.PRNGKey(0)
    kx, kqkv, kproj, kb = jax.random.split(key, 4)
    x = jax.random.normal(kx, (B, N, C), dtype=jnp.float32)
    # Deterministic synthetic parameters (qkv_bias=False -> no qkv bias).
    w_qkv = jax.random.normal(kqkv, (3 * C, C), dtype=jnp.float32) * 0.05
    w_proj = jax.random.normal(kproj, (C, C), dtype=jnp.float32) * 0.05
    b_proj = jax.random.normal(kb, (C,), dtype=jnp.float32) * 0.05

    ref = _reference(x, w_qkv, w_proj, b_proj, unseen_size, num_heads)

    # 1) Tight numerics check: f32 MXU path, exact reciprocal, block_b=1
    #    (2 grid steps -> exercises the pipeline and constant index_maps).
    out_f32 = mcc_decoder_attention(
        x, w_qkv, w_proj, b_proj, unseen_size, num_heads,
        block_b=1, compute_dtype=jnp.float32, approx_reciprocal=False)
    out_f32 = jax.block_until_ready(out_f32)
    assert out_f32.shape == (B, N, C)
    assert jnp.allclose(out_f32, ref, atol=1e-4, rtol=1e-4), \
        "f32 path mismatch vs reference"

    # 2) Default perf path: bf16 MXU inputs (f32 accumulation), EUP approx
    #    reciprocal, auto tiling (whole problem in one grid step here).
    out_bf16 = mcc_decoder_attention(
        x, w_qkv, w_proj, b_proj, unseen_size, num_heads)
    out_bf16 = jax.block_until_ready(out_bf16)
    assert out_bf16.shape == (B, N, C)
    assert jnp.allclose(out_bf16, ref, atol=3e-2, rtol=3e-2), \
        "bf16 path mismatch vs reference"

    print("KERNEL_OK")
</pallas_src>

<mosaic_0001>
module attributes {stable_mosaic.version = 11 : i64} {
  func.func @_mcc_attn_kernel(%arg0: i32, %arg1: memref<2xi32, #tpu.memory_space<smem>>, %arg2: memref<8x32xf32, #tpu.memory_space<vmem>>, %arg3: memref<96x32xf32, #tpu.memory_space<vmem>>, %arg4: memref<32x32xf32, #tpu.memory_space<vmem>>, %arg5: memref<1x32xf32, #tpu.memory_space<vmem>>, %arg6: memref<8x32xf32, #tpu.memory_space<vmem>>, %arg7: memref<8x32xf32, #tpu.memory_space<vmem>>) attributes {dimension_semantics = [#tpu.dimension_semantics<parallel>], iteration_bounds = array<i64: 2>, scalar_prefetch = 1 : i64, scratch_operands = 1 : i64, tpu.core_type = #tpu.core_type<tc>, window_params = [{transform_indices = @transform_0, window_bounds = array<i64: 8, 32>}, {pipeline_mode = #tpu.pipeline_mode<synchronous>, transform_indices = @transform_1, window_bounds = array<i64: 96, 32>}, {pipeline_mode = #tpu.pipeline_mode<synchronous>, transform_indices = @transform_2, window_bounds = array<i64: 32, 32>}, {pipeline_mode = #tpu.pipeline_mode<synchronous>, transform_indices = @transform_3, window_bounds = array<i64: 1, 32>}, {transform_indices = @transform_4, window_bounds = array<i64: 8, 32>}]} {
    %c0 = arith.constant 0 : index
    %0 = memref.load %arg1[%c0] : memref<2xi32, #tpu.memory_space<smem>>
    %c1 = arith.constant 1 : index
    %1 = memref.load %arg1[%c1] : memref<2xi32, #tpu.memory_space<smem>>
    %c0_0 = arith.constant 0 : index
    %c0_1 = arith.constant 0 : index
    %2 = vector.load %arg2[%c0_0, %c0_1] : memref<8x32xf32, #tpu.memory_space<vmem>>, vector<8x32xf32>
    %c0_2 = arith.constant 0 : index
    %c0_3 = arith.constant 0 : index
    %3 = vector.load %arg3[%c0_2, %c0_3] : memref<96x32xf32, #tpu.memory_space<vmem>>, vector<96x32xf32>
    %cst = arith.constant dense<0.000000e+00> : vector<8x96xf32>
    %4 = tpu.matmul %2, %3, %cst {dimension_numbers = #tpu.dot_dimension_numbers<[1], [1], [0], [0], [0, 0, 1, 0], [], []>} : vector<8x32xf32>, vector<96x32xf32>, vector<8x96xf32> -> vector<8x96xf32>
    %5 = vector.extract_strided_slice %4 {offsets = [0, 0], sizes = [8, 32], strides = [1, 1]} : vector<8x96xf32> to vector<8x32xf32>
    %cst_4 = arith.constant 0.353553385 : f32
    %6 = vector.broadcast %cst_4 : f32 to vector<8x32xf32>
    %7 = arith.mulf %5, %6 : vector<8x32xf32>
    %8 = vector.extract_strided_slice %4 {offsets = [0, 32], sizes = [8, 32], strides = [1, 1]} : vector<8x96xf32> to vector<8x32xf32>
    %9 = vector.extract_strided_slice %4 {offsets = [0, 64], sizes = [8, 32], strides = [1, 1]} : vector<8x96xf32> to vector<8x32xf32>
    %10 = tpu.iota {dimensions = array<i32: 0>} : vector<8x8xi32>
    %11 = tpu.iota {dimensions = array<i32: 1>} : vector<8x8xi32>
    %12 = arith.subi %0, %1 : i32
    %13 = vector.broadcast %12 : i32 to vector<8x8xi32>
    %14 = arith.cmpi sge, %11, %13 : vector<8x8xi32>
    %15 = arith.cmpi ne, %10, %11 : vector<8x8xi32>
    %16 = arith.andi %14, %15 : vector<8x8xi1>
    %17 = vector.broadcast %0 : i32 to vector<8x8xi32>
    %18 = arith.cmpi sge, %11, %17 : vector<8x8xi32>
    %19 = arith.ori %16, %18 : vector<8x8xi1>
    %cst_5 = arith.constant -1.000000e+30 : f32
    %cst_6 = arith.constant 0.000000e+00 : f32
    %20 = vector.broadcast %cst_5 : f32 to vector<8x8xf32>
    %21 = vector.broadcast %cst_6 : f32 to vector<8x8xf32>
    %22 = arith.select %19, %20, %21 : vector<8x8xi1>, vector<8x8xf32>
    %23 = vector.extract_strided_slice %7 {offsets = [0, 0], sizes = [8, 8], strides = [1, 1]} : vector<8x32xf32> to vector<8x8xf32>
    %24 = vector.shape_cast %23 : vector<8x8xf32> to vector<1x8x8xf32>
    %25 = vector.extract_strided_slice %8 {offsets = [0, 0], sizes = [8, 8], strides = [1, 1]} : vector<8x32xf32> to vector<8x8xf32>
    %26 = vector.shape_cast %25 : vector<8x8xf32> to vector<1x8x8xf32>
    %27 = vector.extract_strided_slice %9 {offsets = [0, 0], sizes = [8, 8], strides = [1, 1]} : vector<8x32xf32> to vector<8x8xf32>
    %28 = vector.shape_cast %27 : vector<8x8xf32> to vector<1x8x8xf32>
    "tpu.trace_start"() <{level = 10 : i32, message = "bqd,bkd->bqk"}> : () -> ()
    %cst_7 = arith.constant dense<0.000000e+00> : vector<1x8x8xf32>
    %29 = tpu.matmul %24, %26, %cst_7 {dimension_numbers = #tpu.dot_dimension_numbers<[2], [2], [1], [1], [0, 0, 0, 1, 1, 1], [0], [0]>} : vector<1x8x8xf32>, vector<1x8x8xf32>, vector<1x8x8xf32> -> vector<1x8x8xf32>
    "tpu.trace_stop"() : () -> ()
    %30 = vector.shape_cast %22 : vector<8x8xf32> to vector<1x8x8xf32>
    %31 = arith.addf %29, %30 : vector<1x8x8xf32>
    %cst_8 = arith.constant dense<0xFF800000> : vector<1x8xf32>
    %32 = vector.multi_reduction <maximumf>, %31, %cst_8 [2] : vector<1x8x8xf32> to vector<1x8xf32>
    %33 = vector.shape_cast %32 : vector<1x8xf32> to vector<1x8x1xf32>
    %34 = vector.broadcast %33 : vector<1x8x1xf32> to vector<1x8x8xf32>
    %35 = arith.subf %31, %34 : vector<1x8x8xf32>
    %36 = math.exp %35 : vector<1x8x8xf32>
    %cst_9 = arith.constant dense<0.000000e+00> : vector<1x8xf32>
    %37 = vector.multi_reduction <add>, %36, %cst_9 [2] : vector<1x8x8xf32> to vector<1x8xf32>
    %38 = vector.shape_cast %37 : vector<1x8xf32> to vector<1x8x1xf32>
    %39 = tpu.reciprocal %38 : vector<1x8x1xf32> -> vector<1x8x1xf32>
    "tpu.trace_start"() <{level = 10 : i32, message = "bqk,bkd->bqd"}> : () -> ()
    %cst_10 = arith.constant dense<0.000000e+00> : vector<1x8x8xf32>
    %40 = tpu.matmul %36, %28, %cst_10 {dimension_numbers = #tpu.dot_dimension_numbers<[2], [1], [1], [2], [0, 0, 0, 1, 1, 2], [0], [0]>} : vector<1x8x8xf32>, vector<1x8x8xf32>, vector<1x8x8xf32> -> vector<1x8x8xf32>
    "tpu.trace_stop"() : () -> ()
    %41 = vector.broadcast %39 : vector<1x8x1xf32> to vector<1x8x8xf32>
    %42 = arith.mulf %40, %41 : vector<1x8x8xf32>
    %43 = vector.shape_cast %42 : vector<1x8x8xf32> to vector<8x8xf32>
    %c0_11 = arith.constant 0 : index
    %c0_12 = arith.constant 0 : index
    %44 = vector.load %arg7[%c0_11, %c0_12] : memref<8x32xf32, #tpu.memory_space<vmem>>, vector<8x8xf32>
    tpu.vector_store %arg7[%c0_11, %c0_12], %43 {strides = array<i32>} : memref<8x32xf32, #tpu.memory_space<vmem>>, vector<8x8xf32>,
    %45 = vector.extract_strided_slice %7 {offsets = [0, 8], sizes = [8, 8], strides = [1, 1]} : vector<8x32xf32> to vector<8x8xf32>
    %46 = vector.shape_cast %45 : vector<8x8xf32> to vector<1x8x8xf32>
    %47 = vector.extract_strided_slice %8 {offsets = [0, 8], sizes = [8, 8], strides = [1, 1]} : vector<8x32xf32> to vector<8x8xf32>
    %48 = vector.shape_cast %47 : vector<8x8xf32> to vector<1x8x8xf32>
    %49 = vector.extract_strided_slice %9 {offsets = [0, 8], sizes = [8, 8], strides = [1, 1]} : vector<8x32xf32> to vector<8x8xf32>
    %50 = vector.shape_cast %49 : vector<8x8xf32> to vector<1x8x8xf32>
    "tpu.trace_start"() <{level = 10 : i32, message = "bqd,bkd->bqk"}> : () -> ()
    %cst_13 = arith.constant dense<0.000000e+00> : vector<1x8x8xf32>
    %51 = tpu.matmul %46, %48, %cst_13 {dimension_numbers = #tpu.dot_dimension_numbers<[2], [2], [1], [1], [0, 0, 0, 1, 1, 1], [0], [0]>} : vector<1x8x8xf32>, vector<1x8x8xf32>, vector<1x8x8xf32> -> vector<1x8x8xf32>
    "tpu.trace_stop"() : () -> ()
    %52 = vector.shape_cast %22 : vector<8x8xf32> to vector<1x8x8xf32>
    %53 = arith.addf %51, %52 : vector<1x8x8xf32>
    %cst_14 = arith.constant dense<0xFF800000> : vector<1x8xf32>
    %54 = vector.multi_reduction <maximumf>, %53, %cst_14 [2] : vector<1x8x8xf32> to vector<1x8xf32>
    %55 = vector.shape_cast %54 : vector<1x8xf32> to vector<1x8x1xf32>
    %56 = vector.broadcast %55 : vector<1x8x1xf32> to vector<1x8x8xf32>
    %57 = arith.subf %53, %56 : vector<1x8x8xf32>
    %58 = math.exp %57 : vector<1x8x8xf32>
    %cst_15 = arith.constant dense<0.000000e+00> : vector<1x8xf32>
    %59 = vector.multi_reduction <add>, %58, %cst_15 [2] : vector<1x8x8xf32> to vector<1x8xf32>
    %60 = vector.shape_cast %59 : vector<1x8xf32> to vector<1x8x1xf32>
    %61 = tpu.reciprocal %60 : vector<1x8x1xf32> -> vector<1x8x1xf32>
    "tpu.trace_start"() <{level = 10 : i32, message = "bqk,bkd->bqd"}> : () -> ()
    %cst_16 = arith.constant dense<0.000000e+00> : vector<1x8x8xf32>
    %62 = tpu.matmul %58, %50, %cst_16 {dimension_numbers = #tpu.dot_dimension_numbers<[2], [1], [1], [2], [0, 0, 0, 1, 1, 2], [0], [0]>} : vector<1x8x8xf32>, vector<1x8x8xf32>, vector<1x8x8xf32> -> vector<1x8x8xf32>
    "tpu.trace_stop"() : () -> ()
    %63 = vector.broadcast %61 : vector<1x8x1xf32> to vector<1x8x8xf32>
    %64 = arith.mulf %62, %63 : vector<1x8x8xf32>
    %65 = vector.shape_cast %64 : vector<1x8x8xf32> to vector<8x8xf32>
    %c0_17 = arith.constant 0 : index
    %c8 = arith.constant 8 : index
    %66 = vector.load %arg7[%c0_17, %c8] : memref<8x32xf32, #tpu.memory_space<vmem>>, vector<8x8xf32>
    tpu.vector_store %arg7[%c0_17, %c8], %65 {strides = array<i32>} : memref<8x32xf32, #tpu.memory_space<vmem>>, vector<8x8xf32>,
    %67 = vector.extract_strided_slice %7 {offsets = [0, 16], sizes = [8, 8], strides = [1, 1]} : vector<8x32xf32> to vector<8x8xf32>
    %68 = vector.shape_cast %67 : vector<8x8xf32> to vector<1x8x8xf32>
    %69 = vector.extract_strided_slice %8 {offsets = [0, 16], sizes = [8, 8], strides = [1, 1]} : vector<8x32xf32> to vector<8x8xf32>
    %70 = vector.shape_cast %69 : vector<8x8xf32> to vector<1x8x8xf32>
    %71 = vector.extract_strided_slice %9 {offsets = [0, 16], sizes = [8, 8], strides = [1, 1]} : vector<8x32xf32> to vector<8x8xf32>
    %72 = vector.shape_cast %71 : vector<8x8xf32> to vector<1x8x8xf32>
    "tpu.trace_start"() <{level = 10 : i32, message = "bqd,bkd->bqk"}> : () -> ()
    %cst_18 = arith.constant dense<0.000000e+00> : vector<1x8x8xf32>
    %73 = tpu.matmul %68, %70, %cst_18 {dimension_numbers = #tpu.dot_dimension_numbers<[2], [2], [1], [1], [0, 0, 0, 1, 1, 1], [0], [0]>} : vector<1x8x8xf32>, vector<1x8x8xf32>, vector<1x8x8xf32> -> vector<1x8x8xf32>
    "tpu.trace_stop"() : () -> ()
    %74 = vector.shape_cast %22 : vector<8x8xf32> to vector<1x8x8xf32>
    %75 = arith.addf %73, %74 : vector<1x8x8xf32>
    %cst_19 = arith.constant dense<0xFF800000> : vector<1x8xf32>
    %76 = vector.multi_reduction <maximumf>, %75, %cst_19 [2] : vector<1x8x8xf32> to vector<1x8xf32>
    %77 = vector.shape_cast %76 : vector<1x8xf32> to vector<1x8x1xf32>
    %78 = vector.broadcast %77 : vector<1x8x1xf32> to vector<1x8x8xf32>
    %79 = arith.subf %75, %78 : vector<1x8x8xf32>
    %80 = math.exp %79 : vector<1x8x8xf32>
    %cst_20 = arith.constant dense<0.000000e+00> : vector<1x8xf32>
    %81 = vector.multi_reduction <add>, %80, %cst_20 [2] : vector<1x8x8xf32> to vector<1x8xf32>
    %82 = vector.shape_cast %81 : vector<1x8xf32> to vector<1x8x1xf32>
    %83 = tpu.reciprocal %82 : vector<1x8x1xf32> -> vector<1x8x1xf32>
    "tpu.trace_start"() <{level = 10 : i32, message = "bqk,bkd->bqd"}> : () -> ()
    %cst_21 = arith.constant dense<0.000000e+00> : vector<1x8x8xf32>
    %84 = tpu.matmul %80, %72, %cst_21 {dimension_numbers = #tpu.dot_dimension_numbers<[2], [1], [1], [2], [0, 0, 0, 1, 1, 2], [0], [0]>} : vector<1x8x8xf32>, vector<1x8x8xf32>, vector<1x8x8xf32> -> vector<1x8x8xf32>
    "tpu.trace_stop"() : () -> ()
    %85 = vector.broadcast %83 : vector<1x8x1xf32> to vector<1x8x8xf32>
    %86 = arith.mulf %84, %85 : vector<1x8x8xf32>
    %87 = vector.shape_cast %86 : vector<1x8x8xf32> to vector<8x8xf32>
    %c0_22 = arith.constant 0 : index
    %c16 = arith.constant 16 : index
    %88 = vector.load %arg7[%c0_22, %c16] : memref<8x32xf32, #tpu.memory_space<vmem>>, vector<8x8xf32>
    tpu.vector_store %arg7[%c0_22, %c16], %87 {strides = array<i32>} : memref<8x32xf32, #tpu.memory_space<vmem>>, vector<8x8xf32>,
    %89 = vector.extract_strided_slice %7 {offsets = [0, 24], sizes = [8, 8], strides = [1, 1]} : vector<8x32xf32> to vector<8x8xf32>
    %90 = vector.shape_cast %89 : vector<8x8xf32> to vector<1x8x8xf32>
    %91 = vector.extract_strided_slice %8 {offsets = [0, 24], sizes = [8, 8], strides = [1, 1]} : vector<8x32xf32> to vector<8x8xf32>
    %92 = vector.shape_cast %91 : vector<8x8xf32> to vector<1x8x8xf32>
    %93 = vector.extract_strided_slice %9 {offsets = [0, 24], sizes = [8, 8], strides = [1, 1]} : vector<8x32xf32> to vector<8x8xf32>
    %94 = vector.shape_cast %93 : vector<8x8xf32> to vector<1x8x8xf32>
    "tpu.trace_start"() <{level = 10 : i32, message = "bqd,bkd->bqk"}> : () -> ()
    %cst_23 = arith.constant dense<0.000000e+00> : vector<1x8x8xf32>
    %95 = tpu.matmul %90, %92, %cst_23 {dimension_numbers = #tpu.dot_dimension_numbers<[2], [2], [1], [1], [0, 0, 0, 1, 1, 1], [0], [0]>} : vector<1x8x8xf32>, vector<1x8x8xf32>, vector<1x8x8xf32> -> vector<1x8x8xf32>
    "tpu.trace_stop"() : () -> ()
    %96 = vector.shape_cast %22 : vector<8x8xf32> to vector<1x8x8xf32>
    %97 = arith.addf %95, %96 : vector<1x8x8xf32>
    %cst_24 = arith.constant dense<0xFF800000> : vector<1x8xf32>
    %98 = vector.multi_reduction <maximumf>, %97, %cst_24 [2] : vector<1x8x8xf32> to vector<1x8xf32>
    %99 = vector.shape_cast %98 : vector<1x8xf32> to vector<1x8x1xf32>
    %100 = vector.broadcast %99 : vector<1x8x1xf32> to vector<1x8x8xf32>
    %101 = arith.subf %97, %100 : vector<1x8x8xf32>
    %102 = math.exp %101 : vector<1x8x8xf32>
    %cst_25 = arith.constant dense<0.000000e+00> : vector<1x8xf32>
    %103 = vector.multi_reduction <add>, %102, %cst_25 [2] : vector<1x8x8xf32> to vector<1x8xf32>
    %104 = vector.shape_cast %103 : vector<1x8xf32> to vector<1x8x1xf32>
    %105 = tpu.reciprocal %104 : vector<1x8x1xf32> -> vector<1x8x1xf32>
    "tpu.trace_start"() <{level = 10 : i32, message = "bqk,bkd->bqd"}> : () -> ()
    %cst_26 = arith.constant dense<0.000000e+00> : vector<1x8x8xf32>
    %106 = tpu.matmul %102, %94, %cst_26 {dimension_numbers = #tpu.dot_dimension_numbers<[2], [1], [1], [2], [0, 0, 0, 1, 1, 2], [0], [0]>} : vector<1x8x8xf32>, vector<1x8x8xf32>, vector<1x8x8xf32> -> vector<1x8x8xf32>
    "tpu.trace_stop"() : () -> ()
    %107 = vector.broadcast %105 : vector<1x8x1xf32> to vector<1x8x8xf32>
    %108 = arith.mulf %106, %107 : vector<1x8x8xf32>
    %109 = vector.shape_cast %108 : vector<1x8x8xf32> to vector<8x8xf32>
    %c0_27 = arith.constant 0 : index
    %c24 = arith.constant 24 : index
    %110 = vector.load %arg7[%c0_27, %c24] : memref<8x32xf32, #tpu.memory_space<vmem>>, vector<8x8xf32>
    tpu.vector_store %arg7[%c0_27, %c24], %109 {strides = array<i32>} : memref<8x32xf32, #tpu.memory_space<vmem>>, vector<8x8xf32>,
    %c0_28 = arith.constant 0 : index
    %c0_29 = arith.constant 0 : index
    %111 = vector.load %arg7[%c0_28, %c0_29] : memref<8x32xf32, #tpu.memory_space<vmem>>, vector<8x32xf32>
    %c0_30 = arith.constant 0 : index
    %c0_31 = arith.constant 0 : index
    %112 = vector.load %arg4[%c0_30, %c0_31] : memref<32x32xf32, #tpu.memory_space<vmem>>, vector<32x32xf32>
    %cst_32 = arith.constant dense<0.000000e+00> : vector<8x32xf32>
    %113 = tpu.matmul %111, %112, %cst_32 {dimension_numbers = #tpu.dot_dimension_numbers<[1], [1], [0], [0], [0, 0, 1, 0], [], []>} : vector<8x32xf32>, vector<32x32xf32>, vector<8x32xf32> -> vector<8x32xf32>
    %c0_33 = arith.constant 0 : index
    %c0_34 = arith.constant 0 : index
    %114 = vector.load %arg5[%c0_33, %c0_34] : memref<1x32xf32, #tpu.memory_space<vmem>>, vector<1x32xf32>
    %115 = vector.broadcast %114 : vector<1x32xf32> to vector<8x32xf32>
    %116 = arith.addf %113, %115 : vector<8x32xf32>
    %c0_35 = arith.constant 0 : index
    %c0_36 = arith.constant 0 : index
    %117 = vector.load %arg6[%c0_35, %c0_36] : memref<8x32xf32, #tpu.memory_space<vmem>>, vector<8x32xf32>
    tpu.vector_store %arg6[%c0_35, %c0_36], %116 {strides = array<i32>} : memref<8x32xf32, #tpu.memory_space<vmem>>, vector<8x32xf32>,
    return
  }
  func.func @transform_0(%arg0: i32, %arg1: memref<2xi32, #tpu.memory_space<smem>>) -> (i32, i32) {
    %c0_i32 = arith.constant 0 : i32
    %c0_i32_0 = arith.constant 0 : i32
    return %arg0, %c0_i32 : i32, i32
  }
  func.func @transform_1(%arg0: i32, %arg1: memref<2xi32, #tpu.memory_space<smem>>) -> (i32, i32) {
    %c0_i32 = arith.constant 0 : i32
    %c0_i32_0 = arith.constant 0 : i32
    %c0_i32_1 = arith.constant 0 : i32
    return %c0_i32, %c0_i32_0 : i32, i32
  }
  func.func @transform_2(%arg0: i32, %arg1: memref<2xi32, #tpu.memory_space<smem>>) -> (i32, i32) {
    %c0_i32 = arith.constant 0 : i32
    %c0_i32_0 = arith.constant 0 : i32
    %c0_i32_1 = arith.constant 0 : i32
    return %c0_i32, %c0_i32_0 : i32, i32
  }
  func.func @transform_3(%arg0: i32, %arg1: memref<2xi32, #tpu.memory_space<smem>>) -> (i32, i32) {
    %c0_i32 = arith.constant 0 : i32
    %c0_i32_0 = arith.constant 0 : i32
    %c0_i32_1 = arith.constant 0 : i32
    return %c0_i32, %c0_i32_0 : i32, i32
  }
  func.func @transform_4(%arg0: i32, %arg1: memref<2xi32, #tpu.memory_space<smem>>) -> (i32, i32) {
    %c0_i32 = arith.constant 0 : i32
    %c0_i32_0 = arith.constant 0 : i32
    return %arg0, %c0_i32 : i32, i32
  }
}

</mosaic_0001>

<bundles_post_ra>
// kernel: tpu_custom_call.1
= control target key start
LH: loop header
LB: loop body
LE: loop exit
PB: predicated region body
PF: predicated region fallthrough
CT: control target
= control target key end

     0   :  { %s934_s21 = smov [#allocation4]   ;;  %s1159_s0 = inlined_call_operand.vmem [shape: s32[2], index: 0, kind: input, shape index: {}]   ;;  %s1160_s1 = inlined_call_operand.vmem [shape: f32[16,32], index: 1, kind: input, shape index: {}]   ;;  %s1161_s2 = inlined_call_operand.vmem [shape: f32[96,32], index: 2, kind: input, shape index: {}]   ;;  %s1162_s3 = inlined_call_operand.vmem [shape: f32[32,32], index: 3, kind: input, shape index: {}]   ;;  %s1163_s4 = inlined_call_operand.vmem [shape: f32[1,32], index: 4, kind: input, shape index: {}]   ;;  %s1164_s5 = inlined_call_operand.hbm [shape: f32[16,32], index: 5, kind: output, shape index: {}]  }
   0x1   :  { %s11_s20 = sshll.u32 %s1159_s0, 4  ;;  %s12_s20 = int_to_ptr.vmem [resolvable:$true] %s11_s20 }
   0x2   :  { %14 = dma.vmem_to_smem %s12_s20, 16, %s934_s21, [#allocation3] }
   0x3   :  { %912 = dma.done.wait [#allocation3], 16 }
   0x4   :  { %913 = vsyncadd [#allocation3], 4294967280 }
   0x5   :  { %17 = sfence }
   0x6   :  { %18 = vsyncpa [#allocation6], 0 }
   0x7   :  { %20 = vsyncpa [#allocation6 + $0x1], 0  ;;  %s983_s22 = smov 0   ;;  %s985_s23 = smov 0  }
   0x8   :  { %s987_s24 = smov 0   ;;  %s989_s25 = smov 0  }
   0x9 LB: > { %s1004_s0 = sadd.s32 4294967295, %s932_s25   ;;  %s743_s26 = sadd.s32 4294967294, %s932_s25   ;;  %s932_s25 = sphi %s989_s25, %s1170_s25   ;;  %s928_s24 = sphi %s987_s24, %s1169_s24   ;;  %s924_s23 = sphi %s985_s23, %s1168_s23   ;;  %s920_s22 = sphi %s983_s22, %s1167_s22  }
   0xa   : > { %s1008_s27 = sadd.s32 1, %s932_s25   ;;  %s122_s28 = sadd.s32 1, %s928_s24 }
   0xb   : > { %s119_s29 = ssub.s32 %s932_s25, %s1008_s27  ;;  %p132_p0 = scmp.ne.s32.totalorder %s928_s24, %s924_s23 }
   0xc   : > { %p120_p1 = scmp.eq.s32.totalorder %s119_s29, 0  ;;  %p133_p2 = scmp.eq.s32.totalorder %s1004_s0, 1 }
   0xd   : > { %p138_p3 = scmp.ne.s32.totalorder %s924_s23, %s920_s22  ;;  %p139_p4 = scmp.eq.s32.totalorder %s743_s26, 1 }
   0xe   : > { %s1019_s30 = scalar_select %p120_p1, %s928_s24, %s122_s28  }
   0xf   : > { %p1021_p5 = por %p133_p2, %p132_p0  ;;  %p1025_p6 = por %p139_p4, %p138_p3 }
  0x10   : > { %p746_p7 = scmp.ge.s32.totalorder %s932_s25, 1  ;;  %p173_p8 = scmp.lt.s32.totalorder %s932_s25, 3 }
  0x12   : > { %p174_p9 = pnand %p746_p7, %p173_p8 }
  0x13   : > { %p198_p10 = scmp.lt.s32.totalorder (!%p174_p9), %s1004_s0, 1  ;;  %s935_s20 = smov (!%p174_p9), 64  }
  0x14   : > { %177 = sbr.rel (%p174_p9) target bundleno = 1253 (0x4e5), region = 36  ;;  %s936_s21 = smov (!%p174_p9), 96  }
  0x15   : > { %s937_s26 = smov (!%p174_p9), 120   ;;  %s938_s28 = smov (!%p174_p9), 88  }
  0x16   : > { %s939_s29 = smov (!%p174_p9), 56   ;;  %s940_s8 = smov (!%p174_p9), 80  }
  0x17   : > { %s941_s9 = smov (!%p174_p9), 72   ;;  %s942_s10 = smov (!%p174_p9), 104  }
  0x18   : > { %s749_s12 = sld [smem:[#allocation4 + $0x1]] (!%p174_p9)  ;;  %s945_s15 = smov (!%p174_p9), 40  }
  0x19   : > { %v216_v0 = vld [vmem:[%s1161_s2 + $0x58] sm:$0xff]  ;;  %vm217_vm0 = vcmask 261120   ;;  %v215_v1 = vld [vmem:[%s1161_s2 + $0x50] sm:$0xff]  ;;  %v214_v2 = vld [vmem:[%s1161_s2 + $0x48] sm:$0xff]  ;;  %s199_s11 = scalar_select %p198_p10, %s1004_s0, 1  ;;  %vm294_vm1 = vcmask 64512   ;;  %v278_v21 = vlaneseq }
  0x1a   : > { %750 = vmatpush.xpose.msk.msra.mxu0 %vm217_vm0, %v216_v0  ;;  %v213_v3 = vld [vmem:[%s1161_s2 + $0x40] sm:$0xff]  ;;  %v212_v4 = vld [vmem:[%s1161_s2 + $0x38] sm:$0xff]  ;;  %v211_v5 = vld [vmem:[%s1161_s2 + $0x30] sm:$0xff]  ;;  %v943_v26 = vmov 0.0   ;;  %s946_s16 = smov 112   ;;  %s947_s17 = smov 8  }
  0x1b   : > { %v210_v6 = vld [vmem:[%s1161_s2 + $0x28] sm:$0xff]  ;;  %v209_v7 = vld [vmem:[%s1161_s2 + $0x20] sm:$0xff]  ;;  %v208_v8 = vld [vmem:[%s1161_s2 + $0x18] sm:$0xff]  ;;  %s748_s14 = sshll.u32 %s199_s11, 3  ;;  %s202_s11 = sld [smem:[#allocation4]]  ;;  %v279_v22 = vshrl.u32 %v278_v21, 7 }
  0x1c   : > { %v207_v9 = vld [vmem:[%s1161_s2 + $0x10] sm:$0xff]  ;;  %v206_v10 = vld [vmem:[%s1161_s2 + $0x8] sm:$0xff]  ;;  %v205_v11 = vld [vmem:[%s1161_s2] sm:$0xff]  ;;  %s201_s19 = scalar_lea.vmem %s1160_s1, %s748_s14  ;;  %v281_v23 = vand.u32 127, %v278_v21  ;;  %s944_s14 = smov 48  }
  0x1d   : > { %v204_v12 = vld [vmem:[%s201_s19] sm:$0xff]  ;;  %s948_s18 = smov 16   ;;  %s949_s19 = smov 24  }
  0x1e   : > { %751 = vmatpush.xpose.msk.msra.mxu0 %vm217_vm0, %v215_v1  ;;  %vm285_vm3 = vcmp.ne.s32.totalorder %v279_v22, %v281_v23 }
  0x21   : > { %s282_s13 = ssub.s32 %s202_s11, %s749_s12  ;;  %v287_v25 = vstv %s202_s11  ;;  %s195_s11 = sand.u32 1, %s924_s23  }
  0x22   : > { %752 = vmatpush.xpose.msk.msra.mxu0 %vm217_vm0, %v214_v2  ;;  %v283_v24 = vstv %s282_s13  ;;  %vm288_vm5 = vcmp.ge.s32.totalorder %v281_v23, %v287_v25  ;;  %s747_s12 = sshll.u32 %s195_s11, 3  ;;  %s781_s13 = sshll.u32 %s1004_s0, 3 }
  0x23   : > { %vm284_vm2 = vcmp.ge.s32.totalorder %v281_v23, %v283_v24 }
  0x24   : > { %vm286_vm4 = vmand %vm284_vm2, %vm285_vm3 }
  0x25   : > { %vm289_vm6 = vmor %vm286_vm4, %vm288_vm5  ;;  %vm453_vm4 = vcmask 130112  }
  0x26   : > { %753 = vmatpush.xpose.msk.msra.mxu0 %vm217_vm0, %v213_v3  ;;  %v290_v27 = vsel %vm289_vm6, -1e+30, %v943_v26 }
  0x2a   : > { %754 = vmatpush.xpose.msk.msra.mxu0 %vm217_vm0, %v212_v4 }
  0x2e   : > { %755 = vmatpush.xpose.msk.msra.mxu0 %vm217_vm0, %v211_v5 }
  0x32   : > { %756 = vmatpush.xpose.msk.msra.mxu0 %vm217_vm0, %v210_v6 }
  0x36   : > { %757 = vmatpush.xpose.msk.msra.mxu0 %vm217_vm0, %v209_v7 }
  0x3a   : > { %758 = vmatpush.xpose.msk.msra.mxu0 %vm217_vm0, %v208_v8 }
  0x3e   : > { %759 = vmatpush.xpose.msk.msra.mxu0 %vm217_vm0, %v207_v9 }
  0x42   : > { %760 = vmatpush.xpose.msk.msra.mxu0 %vm217_vm0, %v206_v10 }
  0x46   : > { %761 = vmatpush.xpose.msk.msra.mxu0 %vm217_vm0, %v205_v11 }
  0x49   : > { %762 = vmatmul.msk.f32.vlgmr.msra.gmra.mxu0 %vm217_vm0, %v204_v12 }
  0xc6   : > { %v274_v13 = vpop.f32.mrf.mxu0 }
  0xc7   : > { %343 = vrot.lane.b32.xlu2 %v274_v13, %s935_s20  ;;  %292 = vrot.lane.b32.xlu0 %v274_v13, %s936_s21  ;;  %v277_v14 = vmul.f32 0.35355338, %v274_v13 }
  0xc9   : > { %371 = vrot.lane.b32.xlu1 %v277_v14, %s937_s26  ;;  %s669_s26 = scalar_lea.sflag [#allocation6], %s195_s11 }
  0xcf   : > { %373 = vrot.lane.b32.xlu0 %v274_v13, %s938_s28 }
  0xd7   : > { %422 = vrot.lane.b32.xlu0 %v274_v13, %s939_s29 }
  0xdf   : > { %457 = vrot.lane.b32.xlu0 %v274_v13, %s940_s8 }
  0xe7   : > { %541 = vrot.lane.b32.xlu0 %v274_v13, %s941_s9  ;;  %s888_s9 = scalar_lea.hbm %s1164_s5, 16 }
  0xef   : > { %539 = vrot.lane.b32.xlu0 %v277_v14, %s942_s10 }
 0x121   : > { %v344_v15 = vpop.permute.xlu2 %343 }
 0x122   : > { %364 = vmatpush.msra.mxu2 %v344_v15 }
 0x139   : > { %v293_v16 = vpop.permute.xlu0 %292 }
 0x13a   : > { %763 = vmatpush.xpose.msk.msra.mxu1 %vm294_vm1, %v293_v16 }
 0x13b   : > { %v372_v18 = vpop.permute.xlu1 %371 }
 0x13d   : > { %764 = vmatmul.msk.f32.vlgmr.msra.gmra.mxu1 %vm294_vm1, %v277_v14 }
 0x141   : > { %v374_v17 = vpop.permute.xlu0 %373 }
 0x142   : > { %766 = vmatpush.xpose.msk.msra.mxu3 %vm294_vm1, %v374_v17 }
 0x145   : > { %767 = vmatmul.msk.f32.vlgmr.msra.gmra.mxu3 %vm294_vm1, %v372_v18 }
 0x149   : > { %v423_v19 = vpop.permute.xlu0 %422 }
 0x14a   : > { %443 = vmatpush.msrb.mxu2 %v423_v19 }
 0x151   : > { %v458_v20 = vpop.permute.xlu0 %457 }
 0x152   : > { %769 = vmatpush.xpose.msk.msrb.mxu1 %vm294_vm1, %v458_v20 }
 0x159   : > { %v542_v38 = vpop.permute.xlu0 %541 }
 0x161   : > { %v540_v46 = vpop.permute.xlu0 %539 }
 0x1ba   : > { %v317_v28 = vpop.f32.mrf.mxu1 }
 0x1bb   : > { %v318_v29 = vadd.f32 %v317_v28, %v290_v27 }
 0x1bd   : > { %v320_v30 = vsel %vm294_vm1, %v318_v29, -inf }
 0x1be   : > { %321 = vmax.xlane.f32.xlu1 %v320_v30 }
 0x1c8   : > { %v396_v31 = vpop.f32.mrf.mxu3 }
 0x1c9   : > { %v397_v32 = vadd.f32 %v396_v31, %v290_v27 }
 0x1cb   : > { %v399_v33 = vsel %vm294_vm1, %v397_v32, -inf }
 0x1cc   : > { %400 = vmax.xlane.f32.xlu2 %v399_v33 }
 0x1d7   : > { %506 = vrot.lane.b32.xlu1 %v274_v13, %s944_s14 }
 0x1df   : > { %590 = vrot.lane.b32.xlu1 %v274_v13, %s945_s15 }
 0x1e4   : > { %455 = vrot.lane.b32.xlu2 %v277_v14, %s946_s16  ;;  %s679_s16 = scalar_lea.hbm %s1164_s5, %s781_s13 }
 0x1e5   : > { %s683_s21 = sshll.u32 %s679_s16, 4  ;;  %s684_s21 = int_to_ptr.hbm [resolvable:$true] %s683_s21 }
 0x1e6   : > { %s882_s0 = sshra.s32 %s684_s21, 4  ;;  %s883_s0 = int_to_ptr.hbm [resolvable:$true] %s882_s0 }
 0x1e7   : > { %s884_s28 = scalar_lea.hbm %s883_s0, 8  ;;  %p889_p0 = scmp.lt.s32.totalorder %s883_s0, %s1164_s5 }
 0x1e8   : > { %p885_p11 = scmp.ne.s32.totalorder %s883_s0, %s884_s28  ;;  %p890_p1 = scmp.lt.s32.totalorder %s888_s9, %s884_s28 }
 0x1ea   : > { %p886_p12 = pnand %p885_p11, %p1021_p5  ;;  %p891_p2 = por %p890_p1, %p889_p0 }
 0x1ec   : > { %p887_p13 = pneg %p886_p12 }
 0x1ee   : > { %p892_p3 = pnand %p891_p2, %p887_p13 }
 0x231   : > { %v322_v34 = vpop.xlane.xlu1 %321 }
 0x232   : > { %v323_v35 = vsub.f32 %v318_v29, %v322_v34 }
 0x234   : > { %v324_v36 = vmul.f32 1.442695, %v323_v35 }
 0x236   : > { %840 = vpow2.f32 %v324_v36 }
 0x23c   : > { %v841_v37 = vpop.eup %840 }
 0x23d   : > { %765 = vmatmul.msk.f32.vlgmr.msra.gmra.mxu2 %vm294_vm1, %v841_v37  ;;  %v326_v56 = vsel %vm294_vm1, %v841_v37, 0.0 }
 0x23e   : > { %772 = vmatpush.xpose.msk.msra.mxu2 %vm294_vm1, %v542_v38 }
 0x23f   : > { %v401_v39 = vpop.xlane.xlu2 %400 }
 0x240   : > { %v402_v40 = vsub.f32 %v397_v32, %v401_v39 }
 0x242   : > { %v403_v41 = vmul.f32 1.442695, %v402_v40 }
 0x244   : > { %842 = vpow2.f32 %v403_v41 }
 0x247   : > { %v456_v42 = vpop.permute.xlu2 %455 }
 0x248   : > { %770 = vmatmul.msk.f32.vlgmr.msrb.gmra.mxu1 %vm294_vm1, %v456_v42 }
 0x249   : > { %v507_v43 = vpop.permute.xlu1 %506 }
 0x24a   : > { %v843_v44 = vpop.eup %842  ;;  %527 = vmatpush.msrb.mxu3 %v507_v43 }
 0x24b   : > { %768 = vmatmul.msk.f32.vlgmr.msrb.gmra.mxu2 %vm294_vm1, %v843_v44  ;;  %v405_v52 = vsel %vm294_vm1, %v843_v44, 0.0 }
 0x251   : > { %v591_v45 = vpop.permute.xlu1 %590 }
 0x252   : > { %611 = vmatpush.msra.mxu1 %v591_v45 }
 0x253   : > { %773 = vmatmul.msk.f32.vlgmr.msra.gmra.mxu2 %vm294_vm1, %v540_v46 }
 0x2c0   : > { %v366_v48 = vpop.f32.mrf.mxu2 }
 0x2c5   : > { %v480_v47 = vpop.f32.mrf.mxu1 }
 0x2c6   : > { %v481_v49 = vadd.f32 %v480_v47, %v290_v27 }
 0x2c8   : > { %v483_v50 = vsel %vm294_vm1, %v481_v49, -inf }
 0x2c9   : > { %484 = vmax.xlane.f32.xlu2 %v483_v50 }
 0x2ce   : > { %v445_v51 = vpop.f32.mrf.mxu2 }
 0x2d1   : > { %406 = vadd.xlane.f32.xlu2 %v405_v52 }
 0x2d6   : > { %v564_v53 = vpop.f32.mrf.mxu2 }
 0x2d7   : > { %v565_v54 = vadd.f32 %v564_v53, %v290_v27 }
 0x2d9   : > { %v567_v55 = vsel %vm294_vm1, %v565_v54, -inf }
 0x2da   : > { %568 = vmax.xlane.f32.xlu0 %v567_v55  ;;  %v626_v55 = vld [vmem:[%s1162_s3 + $0x10] sm:$0xff] }
 0x2e2   : > { %327 = vadd.xlane.f32.xlu0 %v326_v56  ;;  %v625_v56 = vld [vmem:[%s1162_s3 + $0x8] sm:$0xff] }
 0x33c   : > { %v485_v57 = vpop.xlane.xlu2 %484 }
 0x33d   : > { %v486_v58 = vsub.f32 %v481_v49, %v485_v57  ;;  %v624_v57 = vld [vmem:[%s1162_s3] sm:$0xff] }
 0x33f   : > { %v487_v59 = vmul.f32 1.442695, %v486_v58 }
 0x341   : > { %844 = vpow2.f32 %v487_v59 }
 0x344   : > { %v407_v63 = vpop.xlane.xlu2 %406 }
 0x345   : > { %846 = vrcp.f32 %v407_v63  ;;  %v419_v20 = vand.u32 2147483648, %v407_v63  ;;  %vm413_vm12 = vweird.f32 %v407_v63  ;;  %v417_v22 = vand.u32 2147483647, %v407_v63 }
 0x347   : > { %v845_v60 = vpop.eup %844  ;;  %v420_v24 = vor.u32 1.1754944e-38, %v419_v20  ;;  %vm418_vm14 = vcmp.eq.f32.partialorder %v417_v22, 8.507059e+37 }
 0x348   : > { %771 = vmatmul.msk.f32.vlgmr.msrb.gmra.mxu3 %vm294_vm1, %v845_v60  ;;  %v489_v61 = vsel %vm294_vm1, %v845_v60, 0.0 }
 0x349   : > { %490 = vadd.xlane.f32.xlu1 %v489_v61  ;;  %v839_v61 = vld [vmem:[%s1163_s4] ss:$0 sm:$0xff] }
 0x34b   : > { %v847_v3 = vpop.eup %846 }
 0x34c   : > { %v409_v6 = vmul.f32 %v847_v3, %v407_v63  ;;  %vm414_vm11 = vweird.f32 %v847_v3 }
 0x34d   : > { %v569_v62 = vpop.xlane.xlu0 %568  ;;  %vm415_vm13 = vmor %vm413_vm12, %vm414_vm11 }
 0x34e   : > { %v570_v0 = vsub.f32 %v565_v54, %v569_v62  ;;  %v410_v9 = vsub.f32 1.0, %v409_v6  ;;  %v627_v54 = vld [vmem:[%s1162_s3 + $0x18] sm:$0xff] }
 0x34f   : > { %775 = vmatpush.xpose.msk.msra.mxu3 %vm217_vm0, %v627_v54 }
 0x350   : > { %v571_v1 = vmul.f32 1.442695, %v570_v0  ;;  %v411_v14 = vmul.f32 %v847_v3, %v410_v9 }
 0x352   : > { %848 = vpow2.f32 %v571_v1  ;;  %v412_v18 = vadd.f32 %v847_v3, %v411_v14 }
 0x353   : > { %776 = vmatpush.xpose.msk.msra.mxu3 %vm217_vm0, %v626_v55 }
 0x354   : > { %v416_v23 = vsel %vm415_vm13, %v847_v3, %v412_v18 }
 0x355   : > { %v328_v2 = vpop.xlane.xlu0 %327  ;;  %v421_v25 = vsel %vm418_vm14, %v420_v24, %v416_v23 }
 0x356   : > { %850 = vrcp.f32 %v328_v2  ;;  %v340_v11 = vand.u32 2147483648, %v328_v2  ;;  %v338_v13 = vand.u32 2147483647, %v328_v2  ;;  %vm334_vm8 = vweird.f32 %v328_v2 }
 0x357   : > { %v448_v26 = vmul.f32 %v445_v51, %v421_v25  ;;  %777 = vmatpush.xpose.msk.msra.mxu3 %vm217_vm0, %v625_v56 }
 0x358   : > { %v849_v4 = vpop.eup %848  ;;  %v341_v16 = vor.u32 1.1754944e-38, %v340_v11  ;;  %vm339_vm10 = vcmp.eq.f32.partialorder %v338_v13, 8.507059e+37 }
 0x359   : > { %774 = vmatmul.msk.f32.vlgmr.msra.gmra.mxu1 %vm294_vm1, %v849_v4  ;;  %v573_v5 = vsel %vm294_vm1, %v849_v4, 0.0 }
 0x35a   : > { %574 = vadd.xlane.f32.xlu2 %v573_v5 }
 0x35b   : > { %778 = vmatpush.xpose.msk.msra.mxu3 %vm217_vm0, %v624_v57 }
 0x35c   : > { %v851_v7 = vpop.eup %850 }
 0x35d   : > { %v330_v8 = vmul.f32 %v851_v7, %v328_v2  ;;  %vm335_vm7 = vweird.f32 %v851_v7 }
 0x35e   : > { %vm336_vm9 = vmor %vm334_vm8, %vm335_vm7 }
 0x35f   : > { %v331_v10 = vsub.f32 1.0, %v330_v8 }
 0x361   : > { %v332_v12 = vmul.f32 %v851_v7, %v331_v10 }
 0x363   : > { %v333_v15 = vadd.f32 %v851_v7, %v332_v12 }
 0x365   : > { %v337_v17 = vsel %vm336_vm9, %v851_v7, %v333_v15  ;;  %vm537_vm9 = vcmask 195712  }
 0x366   : > { %v342_v19 = vsel %vm339_vm10, %v341_v16, %v337_v17  ;;  %vm621_vm10 = vcmask 261312  }
 0x367   : > { %v369_v21 = vmul.f32 %v366_v48, %v342_v19 }
 0x369   : > { %370 = vst.msk [vmem:[#allocation2] sm:$0xff] %vm294_vm1, %v369_v21 }
 0x372   : > { %450 = vrot.lane.b32.xlu2 %v448_v26, %s947_s17 }
 0x3bc   : > { %v491_v27 = vpop.xlane.xlu1 %490 }
 0x3bd   : > { %852 = vrcp.f32 %v491_v27  ;;  %v503_v31 = vand.u32 2147483648, %v491_v27  ;;  %v501_v33 = vand.u32 2147483647, %v491_v27  ;;  %vm497_vm2 = vweird.f32 %v491_v27 }
 0x3bf   : > { %v504_v35 = vor.u32 1.1754944e-38, %v503_v31  ;;  %vm502_vm1 = vcmp.eq.f32.partialorder %v501_v33, 8.507059e+37 }
 0x3c3   : > { %v853_v28 = vpop.eup %852 }
 0x3c4   : > { %v493_v29 = vmul.f32 %v853_v28, %v491_v27  ;;  %vm498_vm15 = vweird.f32 %v853_v28 }
 0x3c5   : > { %vm499_vm3 = vmor %vm497_vm2, %vm498_vm15 }
 0x3c6   : > { %v494_v30 = vsub.f32 1.0, %v493_v29 }
 0x3c8   : > { %v495_v32 = vmul.f32 %v853_v28, %v494_v30 }
 0x3ca   : > { %v496_v34 = vadd.f32 %v853_v28, %v495_v32 }
 0x3cb   : > { %v529_v38 = vpop.f32.mrf.mxu3 }
 0x3cc   : > { %v500_v36 = vsel %vm499_vm3, %v853_v28, %v496_v34 }
 0x3cd   : > { %v505_v37 = vsel %vm502_vm1, %v504_v35, %v500_v36  ;;  %v575_v39 = vpop.xlane.xlu2 %574 }
 0x3ce   : > { %v532_v40 = vmul.f32 %v529_v38, %v505_v37  ;;  %854 = vrcp.f32 %v575_v39  ;;  %v587_v45 = vand.u32 2147483648, %v575_v39  ;;  %v585_v47 = vand.u32 2147483647, %v575_v39 }
 0x3cf   : > { %vm581_vm6 = vweird.f32 %v575_v39 }
 0x3d0   : > { %534 = vrot.lane.b32.xlu0 %v532_v40, %s948_s18  ;;  %v588_v49 = vor.u32 1.1754944e-38, %v587_v45  ;;  %vm586_vm8 = vcmp.eq.f32.partialorder %v585_v47, 8.507059e+37 }
 0x3d4   : > { %v855_v41 = vpop.eup %854 }
 0x3d5   : > { %v577_v42 = vmul.f32 %v855_v41, %v575_v39  ;;  %v451_v43 = vpop.permute.xlu2 %450  ;;  %vm582_vm5 = vweird.f32 %v855_v41 }
 0x3d6   : > { %454 = vst.msk [vmem:[#allocation2] sm:$0xff] %vm453_vm4, %v451_v43  ;;  %vm583_vm7 = vmor %vm581_vm6, %vm582_vm5  ;;  %v613_v52 = vpop.f32.mrf.mxu1 }
 0x3d7   : > { %v578_v44 = vsub.f32 1.0, %v577_v42 }
 0x3d9   : > { %v579_v46 = vmul.f32 %v855_v41, %v578_v44 }
 0x3db   : > { %v580_v48 = vadd.f32 %v855_v41, %v579_v46 }
 0x3dd   : > { %v584_v50 = vsel %vm583_vm7, %v855_v41, %v580_v48 }
 0x3de   : > { %v589_v51 = vsel %vm586_vm8, %v588_v49, %v584_v50 }
 0x3df   : > { %v616_v53 = vmul.f32 %v613_v52, %v589_v51 }
 0x3e1   : > { %618 = vrot.lane.b32.xlu0 %v616_v53, %s949_s19  ;;  %s197_s19 = scalar_lea.vmem [#allocation5], %s747_s12 }
 0x3e2   : > { %s681_s20 = sshll.u32 %s197_s19, 4  ;;  %s682_s20 = int_to_ptr.vmem [resolvable:$true] %s681_s20 }
 0x442   : > { %v535_v58 = vpop.permute.xlu0 %534 }
 0x443   : > { %538 = vst.msk [vmem:[#allocation2] sm:$0xff] %vm537_vm9, %v535_v58 }
 0x453   : > { %v619_v59 = vpop.permute.xlu0 %618 }
 0x454   : > { %622 = vst.msk [vmem:[#allocation2] sm:$0xff] %vm621_vm10, %v619_v59 }
 0x45b   : > { %v623_v60 = vld [vmem:[#allocation2] sm:$0xff] }
 0x45c   : > { %779 = vmatmul.msk.f32.vlgmr.msra.gmra.mxu3 %vm217_vm0, %v623_v60 }
 0x4df   : > { %v664_v62 = vpop.f32.mrf.mxu3 }
 0x4e0   : > { %v665_v63 = vadd.f32 %v839_v61, %v664_v62 }
 0x4e2   : > { %667 = vst.msk [vmem:[%s197_s19] sm:$0xff] %vm217_vm0, %v665_v63 }
 0x4e3   : > { %895 = shalt.err (!%p892_p3)
}
 0x4e4   : > { %784 = dma.vmem_to_hbm [thread:$0]  (%p1021_p5), %s682_s20, 128, %s684_s21, %s669_s26  }
 0x4e5 PF: > { %p790_p4 = scmp.ge.s32.totalorder %s932_s25, 2  ;;  %s695_s11 = sand.u32 1, %s920_s22  }
 0x4e6   : > { %s696_s13 = scalar_lea.sflag [#allocation6], %s695_s11 }
 0x4e7   : > { %p787_p7 = pnand %p790_p4, %p1025_p6 }
 0x4e9   : > { %p788_p8 = pneg %p787_p7 }
 0x4eb   : > { %915 = dma.done.wait (%p788_p8), %s696_s13, 128  }
 0x4ec   : > { %917 = vsyncadd (%p788_p8), %s696_s13, 4294967168  ;;  %p23_p9 = scmp.ge.s32.totalorder %s1008_s27, 4   ;;  %s1167_s22 = smov %s924_s23 }
 0x4ed   : > { %s1168_s23 = smov %s928_s24  ;;  %s1169_s24 = smov %s1019_s30 }
 0x4ee   : > { %s1170_s25 = smov %s1008_s27  ;;  %25 = sbr.rel (!%p23_p9) target bundleno = 9 (0x9), region = 71 }
 0x4f3   :  { %702 = vsyncpa [#allocation6], 1 }
 0x4f4   :  { %704 = vsyncpa [#allocation6 + $0x1], 1 }

</bundles_post_ra>
